<compile_context>
chip_gen: v7x
topology: tpu7x:2x2x1
jax: 0.10.0
libtpu: 0.0.40
codegen_flags: <defaults>
</compile_context>

<pallas_src>
from functools import partial

import jax
import jax.numpy as jnp
from jax.experimental import pallas as pl
from jax.experimental.pallas import tpu as pltpu


def layernorm_kernel(x_ref, g_ref, o_ref, *, eps):
    # x_ref/o_ref: (C, tL)  -- channels on sublanes, lanes = spatial (and batch
    #                          in the small-S path)
    # g_ref:       (C, 1)   -- per-channel scale, broadcast across lanes
    x = x_ref[...].astype(jnp.float32)
    mean = jnp.mean(x, axis=0, keepdims=True)                       # (1, tL)
    var = jnp.mean(jnp.square(x - mean), axis=0, keepdims=True)     # unbiased=False
    o_ref[...] = (
        (x - mean) * jax.lax.rsqrt(var + eps) * g_ref[...].astype(jnp.float32)
    ).astype(o_ref.dtype)


def _vmem_limit_bytes():
    """Generation-aware scoped-VMEM limit with a safe fallback."""
    cap = None
    try:
        cap = getattr(pltpu.get_tpu_info(), "vmem_capacity_bytes", None)
    except Exception:
        cap = None
    if not cap:
        return 48 * 1024 * 1024  # safe on every generation (v7x physical = 64 MiB)
    # ~25% headroom for compiler-managed f32 temporaries / other scratch.
    return min(64 * 1024 * 1024, int(cap) * 3 // 4)


def _choose_lane_tile(L, C, itemsize, budget_bytes=4 * 1024 * 1024):
    """Largest multiple-of-128 lane tile within the per-block VMEM budget.

    Does NOT require the tile to divide L — callers use a cdiv grid and let
    Pallas mask the ragged final tile.
    """
    if L <= 128:
        return L  # full-extent block is always legal
    max_lanes = max(128, budget_bytes // max(1, C * itemsize))
    t = min(max_lanes, L)
    t = max(128, (t // 128) * 128)
    return t


def layernorm(x_nchw, g):
    """x_nchw: (B, C, H, W); g: (1, C, 1, 1). Returns (B, C, H, W)."""
    B, C, H, W = x_nchw.shape
    S = H * W

    # eps follows the *input* dtype (torch branch), not any internal cast.
    eps = 1e-5 if x_nchw.dtype == jnp.float32 else 1e-3

    g_l = g.reshape(C, 1)
    itemsize = x_nchw.dtype.itemsize
    vmem_limit = _vmem_limit_bytes()

    cost = pl.CostEstimate(
        flops=7 * B * C * S,
        transcendentals=B * S,
        bytes_accessed=2 * B * C * S * itemsize + C * itemsize,
    )

    if S >= 128:
        # --- Main path: (B, C, S), lane axis = spatial, batch squeezed ---
        x = x_nchw.reshape(B, C, S)
        tS = _choose_lane_tile(S, C, itemsize)

        # Keep >= 2 grid blocks so v7x megacore can shard work across its 2 TCs.
        if B * pl.cdiv(S, tS) < 2 and tS > 128:
            tS = max(128, ((tS // 2) // 128) * 128)

        grid = (B, pl.cdiv(S, tS))

        out = pl.pallas_call(
            partial(layernorm_kernel, eps=eps),
            out_shape=jax.ShapeDtypeStruct((B, C, S), x_nchw.dtype),
            grid_spec=pltpu.PrefetchScalarGridSpec(
                num_scalar_prefetch=0,
                grid=grid,
                in_specs=[
                    pl.BlockSpec((None, C, tS), lambda b, s: (b, 0, s)),
                    pl.BlockSpec((C, 1), lambda b, s: (0, 0)),  # resident g
                ],
                out_specs=pl.BlockSpec((None, C, tS), lambda b, s: (b, 0, s)),
            ),
            compiler_params=pltpu.CompilerParams(
                dimension_semantics=("parallel", "parallel"),
                vmem_limit_bytes=vmem_limit,
            ),
            cost_estimate=cost,
        )(x, g_l)
        return out.reshape(B, C, H, W)

    # --- Small-spatial path (S < 128): fold batch into the lane axis so stores
    #     stay lane-dense.  Tensors here are tiny, so the transpose is cheap. ---
    L = B * S
    x2 = jnp.transpose(x_nchw.reshape(B, C, S), (1, 0, 2)).reshape(C, L)
    tL = _choose_lane_tile(L, C, itemsize)
    grid = (pl.cdiv(L, tL),)

    out2 = pl.pallas_call(
        partial(layernorm_kernel, eps=eps),
        out_shape=jax.ShapeDtypeStruct((C, L), x_nchw.dtype),
        grid_spec=pltpu.PrefetchScalarGridSpec(
            num_scalar_prefetch=0,
            grid=grid,
            in_specs=[
                pl.BlockSpec((C, tL), lambda s: (0, s)),
                pl.BlockSpec((C, 1), lambda s: (0, 0)),  # resident g
            ],
            out_specs=pl.BlockSpec((C, tL), lambda s: (0, s)),
        ),
        compiler_params=pltpu.CompilerParams(
            dimension_semantics=("parallel",),
            vmem_limit_bytes=vmem_limit,
        ),
        cost_estimate=cost,
    )(x2, g_l)

    return jnp.transpose(out2.reshape(C, B, S), (1, 0, 2)).reshape(B, C, H, W)


def layernorm_ref(x, g):
    """Pure-JAX reference matching the PyTorch module."""
    eps = 1e-5 if x.dtype == jnp.float32 else 1e-3
    mean = jnp.mean(x, axis=1, keepdims=True)
    var = jnp.mean((x - mean) ** 2, axis=1, keepdims=True)  # unbiased=False
    return (x - mean) * jax.lax.rsqrt(var + eps) * g


if __name__ == "__main__":
    key = jax.random.PRNGKey(0)
    k_x, k_g, k_x2 = jax.random.split(key, 3)

    # Main path: S = 256 (multiple of 128)
    B, C, H, W = 2, 4, 16, 16
    x = jax.random.normal(k_x, (B, C, H, W), dtype=jnp.float32)
    g = 1.0 + 0.1 * jax.random.normal(k_g, (1, C, 1, 1), dtype=jnp.float32)

    out = jax.block_until_ready(layernorm(x, g))
    ref = layernorm_ref(x, g)
    assert out.shape == (B, C, H, W)
    assert jnp.allclose(out, ref, atol=1e-5, rtol=1e-5), "mismatch vs reference (main path)"

    # Small-spatial path: S = 64 < 128 (batch folded into the lane axis)
    Bs, Cs, Hs, Ws = 2, 4, 8, 8
    xs = jax.random.normal(k_x2, (Bs, Cs, Hs, Ws), dtype=jnp.float32)
    gs = g[:, :Cs]

    outs = jax.block_until_ready(layernorm(xs, gs))
    refs = layernorm_ref(xs, gs)
    assert outs.shape == (Bs, Cs, Hs, Ws)
    assert jnp.allclose(outs, refs, atol=1e-5, rtol=1e-5), "mismatch vs reference (small-S path)"

    print("KERNEL_OK")
</pallas_src>

<mosaic_0001>
module attributes {stable_mosaic.version = 11 : i64} {
  func.func @layernorm_kernel(%arg0: i32, %arg1: i32, %arg2: memref<1x4x256xf32, #tpu.memory_space<vmem>>, %arg3: memref<4x1xf32, #tpu.memory_space<vmem>>, %arg4: memref<1x4x256xf32, #tpu.memory_space<vmem>>) attributes {dimension_semantics = [#tpu.dimension_semantics<parallel>, #tpu.dimension_semantics<parallel>], iteration_bounds = array<i64: 2, 1>, scalar_prefetch = 0 : i64, scratch_operands = 0 : i64, tpu.core_type = #tpu.core_type<tc>, window_params = [{transform_indices = @transform_0, window_bounds = array<i64: 1, 4, 256>}, {pipeline_mode = #tpu.pipeline_mode<synchronous>, transform_indices = @transform_1, window_bounds = array<i64: 4, 1>}, {transform_indices = @transform_2, window_bounds = array<i64: 1, 4, 256>}]} {
    %c0 = arith.constant 0 : index
    %c0_0 = arith.constant 0 : index
    %c0_1 = arith.constant 0 : index
    %0 = vector.load %arg2[%c0, %c0_0, %c0_1] : memref<1x4x256xf32, #tpu.memory_space<vmem>>, vector<1x4x256xf32>
    %1 = vector.shape_cast %0 : vector<1x4x256xf32> to vector<4x256xf32>
    %cst = arith.constant dense<0.000000e+00> : vector<256xf32>
    %2 = vector.multi_reduction <add>, %1, %cst [0] : vector<4x256xf32> to vector<256xf32>
    %3 = vector.shape_cast %2 : vector<256xf32> to vector<1x256xf32>
    %cst_2 = arith.constant 4.000000e+00 : f32
    %4 = vector.broadcast %cst_2 : f32 to vector<1x256xf32>
    %5 = arith.divf %3, %4 : vector<1x256xf32>
    %6 = vector.broadcast %5 : vector<1x256xf32> to vector<4x256xf32>
    %7 = arith.subf %1, %6 : vector<4x256xf32>
    %8 = arith.mulf %7, %7 : vector<4x256xf32>
    %cst_3 = arith.constant dense<0.000000e+00> : vector<256xf32>
    %9 = vector.multi_reduction <add>, %8, %cst_3 [0] : vector<4x256xf32> to vector<256xf32>
    %10 = vector.shape_cast %9 : vector<256xf32> to vector<1x256xf32>
    %cst_4 = arith.constant 4.000000e+00 : f32
    %11 = vector.broadcast %cst_4 : f32 to vector<1x256xf32>
    %12 = arith.divf %10, %11 : vector<1x256xf32>
    %13 = vector.broadcast %5 : vector<1x256xf32> to vector<4x256xf32>
    %14 = arith.subf %1, %13 : vector<4x256xf32>
    %cst_5 = arith.constant 9.99999974E-6 : f32
    %15 = vector.broadcast %cst_5 : f32 to vector<1x256xf32>
    %16 = arith.addf %12, %15 : vector<1x256xf32>
    %17 = math.rsqrt %16 : vector<1x256xf32>
    %18 = vector.broadcast %17 : vector<1x256xf32> to vector<4x256xf32>
    %19 = arith.mulf %14, %18 : vector<4x256xf32>
    %c0_6 = arith.constant 0 : index
    %c0_7 = arith.constant 0 : index
    %20 = vector.load %arg3[%c0_6, %c0_7] : memref<4x1xf32, #tpu.memory_space<vmem>>, vector<4x1xf32>
    %21 = vector.broadcast %20 : vector<4x1xf32> to vector<4x256xf32>
    %22 = arith.mulf %19, %21 : vector<4x256xf32>
    %c0_8 = arith.constant 0 : index
    %c0_9 = arith.constant 0 : index
    %c0_10 = arith.constant 0 : index
    %23 = vector.load %arg4[%c0_8, %c0_9, %c0_10] : memref<1x4x256xf32, #tpu.memory_space<vmem>>, vector<1x4x256xf32>
    %24 = vector.shape_cast %23 : vector<1x4x256xf32> to vector<4x256xf32>
    %25 = vector.shape_cast %22 : vector<4x256xf32> to vector<1x4x256xf32>
    tpu.vector_store %arg4[%c0_8, %c0_9, %c0_10], %25 {strides = array<i32>} : memref<1x4x256xf32, #tpu.memory_space<vmem>>, vector<1x4x256xf32>,
    return
  }
  func.func @transform_0(%arg0: i32, %arg1: i32) -> (i32, i32, i32) {
    %c0_i32 = arith.constant 0 : i32
    %c0_i32_0 = arith.constant 0 : i32
    return %arg0, %c0_i32, %arg1 : i32, i32, i32
  }
  func.func @transform_1(%arg0: i32, %arg1: i32) -> (i32, i32) {
    %c0_i32 = arith.constant 0 : i32
    %c0_i32_0 = arith.constant 0 : i32
    %c0_i32_1 = arith.constant 0 : i32
    return %c0_i32, %c0_i32_0 : i32, i32
  }
  func.func @transform_2(%arg0: i32, %arg1: i32) -> (i32, i32, i32) {
    %c0_i32 = arith.constant 0 : i32
    %c0_i32_0 = arith.constant 0 : i32
    return %arg0, %c0_i32, %arg1 : i32, i32, i32
  }
}

</mosaic_0001>

<bundles_post_ra>
// kernel: tpu_custom_call.1
= control target key start
LH: loop header
LB: loop body
LE: loop exit
PB: predicated region body
PF: predicated region fallthrough
CT: control target
= control target key end

     0   :  { %7 = vsyncpa [#allocation3], 0  ;;  %s755_s0 = inlined_call_operand.hbm [shape: f32[2,4,256], index: 0, kind: input, shape index: {}]   ;;  %s756_s1 = inlined_call_operand.vmem [shape: f32[4,1], index: 1, kind: input, shape index: {}]   ;;  %s757_s2 = inlined_call_operand.hbm [shape: f32[2,4,256], index: 2, kind: output, shape index: {}]  }
   0x1   :  { %9 = vsyncpa [#allocation3 + $0x1], 0 }
   0x2   :  { %10 = vsyncpa [#allocation4], 0 }
   0x3   :  { %12 = vsyncpa [#allocation4 + $0x1], 0  ;;  %s572_s9 = smov 0   ;;  %s574_s10 = smov 0  }
   0x4   :  { %s576_s11 = smov 0   ;;  %s578_s12 = smov 0  }
   0x5   :  { %s580_s13 = smov 0   ;;  %s582_s14 = smov 0  }
   0x6 LB: > { %s352_s15 = sadd.s32 4294967295, %s551_s14   ;;  %s353_s16 = sadd.s32 4294967294, %s551_s14   ;;  %s551_s14 = sphi %s582_s14, %s18_s14   ;;  %s547_s13 = sphi %s580_s13, %s773_s13   ;;  %s543_s12 = sphi %s578_s12, %s772_s12   ;;  %s539_s11 = sphi %s576_s11, %s771_s11   ;;  %s535_s10 = sphi %s574_s10, %s770_s10   ;;  %s531_s9 = sphi %s572_s9, %s769_s9  }
   0x7   : > { %s30_s17 = sadd.s32 1, %s547_s13  ;;  %s39_s18 = sadd.s32 1, %s539_s11 }
   0x8   : > { %p32_p0 = scmp.ge.s32.totalorder %s30_s17, 2  ;;  %p46_p1 = scmp.ne.s32.totalorder %s539_s11, %s535_s10 }
   0x9   : > { %p47_p2 = scmp.eq.s32.totalorder %s551_s14, 0  ;;  %p52_p3 = scmp.ne.s32.totalorder %s535_s10, %s531_s9 }
   0xa   : > { %s775_s17 = smov (%p32_p0, %s30_s17), 0  ;;  %p53_p5 = scmp.eq.s32.totalorder %s352_s15, 0 }
   0xb   : > { %p613_p4 = por %p47_p2, %p46_p1  ;;  %s34_s20 = ssub.s32 %s547_s13, %s775_s17 }
   0xc   : > { %p99_p6 = scmp.eq.s32.totalorder %s352_s15, 1  ;;  %p37_p7 = scmp.eq.s32.totalorder %s34_s20, 0 }
   0xd   : > { %p619_p8 = por %p53_p5, %p52_p3  ;;  %p105_p10 = scmp.eq.s32.totalorder %s353_s16, 1 }
   0xe   : > { %p623_p9 = por %p99_p6, %p46_p1  ;;  %p381_p13 = scmp.lt.s32.totalorder %s551_s14, 2 }
   0xf   : > { %s628_s23 = scalar_select %p37_p7, %s539_s11, %s39_s18  }
  0x10   : > { %s761_s22 = scalar_select %p623_p9, 1, 0 }
  0x11   : > { %p630_p11 = por %p105_p10, %p52_p3  ;;  %s128_s25 = sand.u32 1, %s539_s11  }
  0x12   : > { %s356_s26 = sshll.u32 %s128_s25, 3  ;;  %s367_s27 = sshll.u32 %s547_s13, 7 }
  0x13   : > { %s762_s24 = scalar_select %p630_p11, 1, 0 }
  0x14   : > { %s641_s30 = scalar_lea.hbm %s755_s0, %s367_s27  ;;  %s132_s3 = scalar_lea.vmem [#allocation2], %s356_s26 }
  0x15   : > { %s142_s4 = sshll.u32 %s132_s3, 4  ;;  %p647_p0 = pnand %p381_p13, %p613_p4  ;;  %s643_s4 = int_to_ptr.vmem [resolvable:$true] %s142_s4 }
  0x16   : > { %s129_s6 = scalar_lea.sflag [#allocation3], %s128_s25  ;;  %s439_s7 = scalar_lea.hbm %s641_s30, 128 }
  0x17   : > { %p440_p3 = scmp.ne.s32.totalorder %s641_s30, %s439_s7  ;;  %p441_p5 = pneg %p647_p0 }
  0x18   : > { %s444_s16 = scalar_lea.hbm %s755_s0, 256  ;;  %p445_p4 = scmp.lt.u32.totalorder %s641_s30, %s755_s0 }
  0x19   : > { %p442_p6 = pnand %p441_p5, %p440_p3  ;;  %p446_p10 = scmp.lt.u32.totalorder %s444_s16, %s439_s7 }
  0x1a   : > { %p448_p12 = scmp.lt.u32.totalorder %s439_s7, %s641_s30 }
  0x1b   : > { %p443_p7 = pneg %p442_p6  ;;  %p447_p13 = por %p446_p10, %p445_p4 }
  0x1d   : > { %p449_p1 = por %p448_p12, %p447_p13 }
  0x1f   : > { %p450_p2 = pnand %p449_p1, %p443_p7 }
  0x21   : > { %453 = shalt.err (!%p450_p2)
}
  0x22   : > { %s454_s20 = scalar_lea.vmem %s643_s4, 128  ;;  %s553_s25 = smov [#allocation2]  }
  0x23   : > { %p455_p3 = scmp.ne.s32.totalorder %s643_s4, %s454_s20  ;;  %s459_s26 = sshll.u32 %s553_s25, 4  ;;  %s460_s26 = int_to_ptr.vmem [resolvable:$false] %s459_s26 }
  0x24   : > { %s461_s27 = scalar_lea.vmem %s460_s26, 256  ;;  %p462_p9 = scmp.lt.s32.totalorder %s643_s4, %s460_s26 }
  0x25   : > { %p457_p6 = pnand %p455_p3, %p441_p5  ;;  %p463_p4 = scmp.lt.s32.totalorder %s461_s27, %s454_s20 }
  0x27   : > { %p458_p11 = pneg %p457_p6  ;;  %p464_p10 = por %p463_p4, %p462_p9 }
  0x29   : > { %p465_p12 = pnand %p464_p10, %p458_p11 }
  0x2b   : > { %468 = shalt.err (!%p465_p12)
}
  0x2c   : > { %376 = dma.hbm_to_vmem [thread:$0]  (!%p647_p0), %s641_s30, 128, %s643_s4, %s129_s6  }
  0x2d   : > { %p764_p1 = scmp.lt.s32.totalorder %s551_s14, 3  ;;  %p765_p2 = scmp.ge.s32.totalorder %s551_s14, 1 }
  0x2f   : > { %p148_p5 = pnand %p765_p2, %p764_p1 }
  0x30   : > { %s683_s28 = sand.u32 (!%p148_p5), 1, %s535_s10  }
  0x31   : > { %151 = sbr.rel (%p148_p5) target bundleno = 205 (0xcd), region = 28  ;;  %s360_s29 = sshll.u32 (!%p148_p5), %s683_s28, 3 }
  0x32   : > { %s154_s3 = scalar_lea.sflag (!%p148_p5), [#allocation3], %s683_s28  ;;  %s157_s5 = scalar_lea.vmem (!%p148_p5), [#allocation2], %s360_s29 }
  0x38   : > { %522 = dma.done.wait (%p619_p8), %s154_s3, 128  }
  0x39   : > { %524 = vsyncadd (%p619_p8), %s154_s3, 4294967168  ;;  %v554_v0 = vmov 0   ;;  %v236_v1 = vld [vmem:[%s756_s1] sm:$0xf]  ;;  %vm184_vm0 = vcmask 1043456   ;;  %v244_v44 = vlaneseq  ;;  %s368_s21 = sshll.u32 %s543_s12, 7 }
  0x3a   : > { %433 = vset.pattern.permute.xlu0 %v554_v0  ;;  %v180_v2 = vld [vmem:[%s157_s5] sm:$0xff]  ;;  %v555_v42 = vmov 839922192   ;;  %s177_s6 = scalar_lea.vmem [#allocation5], %s360_s29  ;;  %s706_s16 = scalar_lea.hbm %s757_s2, %s368_s21 }
  0x3b   : > { %239 = vperm.xlu0 %433, %v236_v1   ;;  %v182_v3 = vcombine.high %v180_v2, %v180_v2  ;;  %v185_v4 = vsel %vm184_vm0, %v180_v2, 0.0  ;;  %v242_v43 = vunpack.c.l.s4 %v555_v42  ;;  %v245_v48 = vshrl.u32 %v244_v44, 7  ;;  %s268_s7 = sshll.u32 %s177_s6, 4  ;;  %s252_s18 = scalar_lea.sflag [#allocation4], %s683_s28  ;;  %s708_s7 = int_to_ptr.vmem [resolvable:$true] %s268_s7 }
  0x3c   : > { %v186_v6 = vrot.slane %v185_v4, 4  ;;  %s469_s19 = scalar_lea.vmem %s708_s7, 128  ;;  %p766_p9 = scmp.ne.s32.totalorder %s761_s22, 0 }
  0x3d   : > { %v192_v5 = vsel %vm184_vm0, %v182_v3, 0.0  ;;  %v243_v47 = vunpack.c.0.s8 %v242_v43  ;;  %p470_p8 = scmp.ne.s32.totalorder %s708_s7, %s469_s19  ;;  %s556_s12 = smov [#allocation5]  }
  0x3e   : > { %v193_v7 = vrot.slane %v192_v5, 4  ;;  %v187_v8 = vadd.f32 %v186_v6, %v185_v4  ;;  %s473_s20 = sshll.u32 %s556_s12, 4  ;;  %s474_s20 = int_to_ptr.vmem [resolvable:$false] %s473_s20 }
  0x3f   : > { %v246_v50 = vsub.s32 %v243_v47, %v245_v48  ;;  %p471_p11 = pnand %p470_p8, %p766_p9  ;;  %s475_s25 = scalar_lea.vmem %s474_s20, 256 }
  0x40   : > { %v194_v9 = vadd.f32 %v193_v7, %v192_v5  ;;  %v188_v10 = vrot.slane %v187_v8, 2  ;;  %p476_p7 = scmp.lt.s32.totalorder %s708_s7, %s474_s20  ;;  %p477_p13 = scmp.lt.s32.totalorder %s475_s25, %s469_s19 }
  0x41   : > { %p472_p0 = pneg %p471_p11 }
  0x42   : > { %v195_v11 = vrot.slane %v194_v9, 2  ;;  %v189_v12 = vadd.f32 %v188_v10, %v187_v8  ;;  %p478_p3 = por %p477_p13, %p476_p7 }
  0x44   : > { %v196_v13 = vadd.f32 %v195_v11, %v194_v9  ;;  %v190_v14 = vrot.slane %v189_v12, 1  ;;  %p479_p6 = pnand %p478_p3, %p472_p0 }
  0x46   : > { %v197_v15 = vrot.slane %v196_v13, 1  ;;  %v191_v16 = vadd.f32 %v190_v14, %v189_v12 }
  0x48   : > { %v198_v17 = vadd.f32 %v197_v15, %v196_v13  ;;  %v200_v18 = vmul.f32 0.25, %v191_v16 }
  0x4a   : > { %v201_v19 = vmul.f32 0.25, %v198_v17 }
  0x4c   : > { %v204_v20 = vcombine.low %v200_v18, %v201_v19 }
  0x4e   : > { %v206_v21 = vsub.f32 %v180_v2, %v204_v20 }
  0x50   : > { %v207_v22 = vmul.f32 %v206_v21, %v206_v21 }
  0x52   : > { %v209_v23 = vcombine.high %v207_v22, %v207_v22  ;;  %v211_v24 = vsel %vm184_vm0, %v207_v22, 0.0 }
  0x53   : > { %v212_v26 = vrot.slane %v211_v24, 4 }
  0x54   : > { %v218_v25 = vsel %vm184_vm0, %v209_v23, 0.0 }
  0x55   : > { %v219_v27 = vrot.slane %v218_v25, 4  ;;  %v213_v28 = vadd.f32 %v212_v26, %v211_v24 }
  0x57   : > { %v220_v29 = vadd.f32 %v219_v27, %v218_v25  ;;  %v214_v30 = vrot.slane %v213_v28, 2 }
  0x59   : > { %v221_v31 = vrot.slane %v220_v29, 2  ;;  %v215_v32 = vadd.f32 %v214_v30, %v213_v28 }
  0x5b   : > { %v222_v33 = vadd.f32 %v221_v31, %v220_v29  ;;  %v216_v34 = vrot.slane %v215_v32, 1 }
  0x5d   : > { %v223_v35 = vrot.slane %v222_v33, 1  ;;  %v217_v36 = vadd.f32 %v216_v34, %v215_v32 }
  0x5f   : > { %v224_v37 = vadd.f32 %v223_v35, %v222_v33  ;;  %v225_v38 = vmul.f32 0.25, %v217_v36 }
  0x61   : > { %v226_v39 = vmul.f32 0.25, %v224_v37  ;;  %v227_v40 = vadd.f32 1e-05, %v225_v38 }
  0x63   : > { %v228_v41 = vadd.f32 1e-05, %v226_v39  ;;  %435 = vrsqrt.f32 %v227_v40 }
  0x65   : > { %437 = vrsqrt.f32 %v228_v41 }
  0x6d   : > { %v436_v45 = vpop.eup %435 }
  0x6f   : > { %v438_v46 = vpop.eup %437 }
  0x70   : > { %v233_v49 = vcombine.low %v436_v45, %v438_v46 }
  0x72   : > { %v235_v51 = vmul.f32 %v233_v49, %v206_v21 }
  0xba   : > { %v240_v52 = vpop.permute.xlu0 %239 }
  0xbb   : > { %v247_v53 = vrot.slane %v240_v52, %v246_v50 }
  0xbd   : > { %v249_v54 = vmul.f32 %v247_v53, %v235_v51 }
  0xbf   : > { %250 = vst [vmem:[%s177_s6] sm:$0xff] %v249_v54 }
  0xc0   : > { %482 = shalt.err (!%p479_p6)
}
  0xc1   : > { %s483_s26 = scalar_lea.hbm %s706_s16, 128  ;;  %s487_s29 = scalar_lea.hbm %s757_s2, 256 }
  0xc2   : > { %p484_p4 = scmp.ne.s32.totalorder %s706_s16, %s483_s26  ;;  %p488_p1 = scmp.lt.u32.totalorder %s706_s16, %s757_s2 }
  0xc3   : > { %p489_p2 = scmp.lt.u32.totalorder %s487_s29, %s483_s26  ;;  %p491_p8 = scmp.lt.u32.totalorder %s483_s26, %s706_s16 }
  0xc4   : > { %p485_p10 = pnand %p484_p4, %p766_p9 }
  0xc5   : > { %p490_p5 = por %p489_p2, %p488_p1 }
  0xc6   : > { %p486_p12 = pneg %p485_p10 }
  0xc7   : > { %p492_p11 = por %p491_p8, %p490_p5 }
  0xc9   : > { %p493_p0 = pnand %p492_p11, %p486_p12 }
  0xcb   : > { %496 = shalt.err (!%p493_p0)
}
  0xcc   : > { %371 = dma.vmem_to_hbm [thread:$0]  (%p766_p9), %s708_s7, 128, %s706_s16, %s252_s18  }
  0xcd PF: > { %s280_s30 = sand.u32 1, %s531_s9   ;;  %p767_p7 = scmp.ne.s32.totalorder %s762_s24, 0 }
  0xce   : > { %p768_p13 = scmp.ge.s32.totalorder %s551_s14, 2  ;;  %s281_s4 = scalar_lea.sflag [#allocation4], %s280_s30 }
  0xd0   : > { %p378_p3 = pnand %p768_p13, %p767_p7 }
  0xd2   : > { %526 = dma.done.wait (!%p378_p3), %s281_s4, 128  }
  0xd3   : > { %528 = vsyncadd (!%p378_p3), %s281_s4, 4294967168  ;;  %s18_s14 = sadd.s32 1, %s551_s14   ;;  %s769_s9 = smov %s535_s10 }
  0xd4   : > { %p15_p6 = scmp.ge.s32.totalorder %s18_s14, 4   ;;  %s770_s10 = smov %s539_s11 }
  0xd5   : > { %s771_s11 = smov %s628_s23  ;;  %s772_s12 = smov %s547_s13 }
  0xd6   : > { %s773_s13 = smov %s775_s17  ;;  %17 = sbr.rel (!%p15_p6) target bundleno = 6 (0x6), region = 73 }
  0xdd   :  { %286 = vsyncpa [#allocation3], 1 }
  0xde   :  { %288 = vsyncpa [#allocation3 + $0x1], 1 }
  0xdf   :  { %289 = vsyncpa [#allocation4], 1 }
  0xe0   :  { %291 = vsyncpa [#allocation4 + $0x1], 1 }

</bundles_post_ra>
